<compile_context>
chip_gen: v7x
topology: tpu7x:2x2x1
jax: 0.10.0
libtpu: 0.0.40
codegen_flags: <defaults>
</compile_context>

<pallas_src>
import jax
import jax.numpy as jnp
from jax.experimental import pallas as pl
from jax.experimental.pallas import tpu as pltpu


_LANE = 128


def _round_up(x, m):
    return ((x + m - 1) // m) * m


def _unembed_kernel(x_ref, o_ref):
    """x_ref: (tb, tl, C) input tile -> o_ref: (tb, C, tl) minor-dims transposed."""
    # .T on a 3-D block would reverse ALL axes; swapaxes only the minor two.
    o_ref[...] = jnp.swapaxes(x_ref[...], -1, -2)


def _vmem_budget():
    """Return (tile_budget_bytes, vmem_limit_bytes) tuned per TPU generation."""
    try:
        vmem_bytes = int(getattr(pltpu.get_tpu_info(), "vmem_capacity_bytes", 0))
    except Exception:
        vmem_bytes = 0
    if vmem_bytes >= 100 * 1024 * 1024:
        # v5e / v6e: 128 MiB physical VMEM -> fatter tiles, bigger scoped limit.
        return 24 * 1024 * 1024, 64 * 1024 * 1024
    # v7x (64 MiB per TC) or unknown: stay conservative (4 live buffers must fit).
    return 10 * 1024 * 1024, 32 * 1024 * 1024


def _choose_tiles(batch_size, num_tokens, num_channels, itemsize, budget):
    """Pick (tb, tl): batch tile and lane-dense (multiple-of-128) token tile."""
    bytes_per_token = num_channels * itemsize
    l_pad = _round_up(num_tokens, _LANE)  # lane-dense output stores, even for tails

    # Largest multiple-of-128 token tile whose double-buffered in+out tiles
    # (2x in + 2x out = 4 * tl * C * itemsize) fit the budget. No hard cap:
    # if the whole padded token axis fits, the output write-back per batch is
    # one contiguous (C, L) slab.
    max_tl = budget // (4 * bytes_per_token)
    max_tl = max(_LANE, (max_tl // _LANE) * _LANE)
    tl = min(l_pad, max_tl)

    # Fold a batch tile into the block when per-batch payloads are small, so each
    # grid step moves a fat DMA (amortizes the ~0.35 us/step pipeline overhead).
    tb = 1
    block_bytes = 4 * tl * bytes_per_token  # double-buffered in + out per batch row
    if tl >= l_pad and block_bytes < 2 * 1024 * 1024:
        by_budget = max(1, budget // block_bytes)
        by_target = max(1, (4 * 1024 * 1024) // max(1, tl * bytes_per_token))
        tb = min(batch_size, by_budget, by_target)

    # Keep at least two grid steps so v7x's two TensorCores both get work
    # (negligible cost on single-TC v5e/v6e).
    if pl.cdiv(batch_size, tb) * pl.cdiv(num_tokens, tl) < 2:
        if batch_size >= 2:
            tb = max(1, pl.cdiv(batch_size, 2))
        else:
            half = _round_up(pl.cdiv(num_tokens, 2), _LANE)
            # Only split the token axis when each half is still a fat DMA;
            # tiny single-block problems are overhead-dominated either way.
            if half < tl and half * bytes_per_token >= 512 * 1024:
                tl = half
    return tb, tl


def patch_unembed_pallas(embeddings, x_size):
    """JAX/Pallas equivalent of Swin2SRPatchUnEmbeddings.forward.

    embeddings: (B, H*W, C)
    x_size:     (H, W)
    returns:    (B, C, H, W)
    """
    batch_size, num_tokens, num_channels = embeddings.shape
    height, width = x_size
    if height * width != num_tokens:
        raise ValueError(
            f"x_size {x_size} inconsistent with sequence length {num_tokens}"
        )

    itemsize = jnp.dtype(embeddings.dtype).itemsize
    budget, vmem_limit = _vmem_budget()
    tb, tl = _choose_tiles(batch_size, num_tokens, num_channels, itemsize, budget)

    grid = (pl.cdiv(batch_size, tb), pl.cdiv(num_tokens, tl))

    out = pl.pallas_call(
        _unembed_kernel,
        out_shape=jax.ShapeDtypeStruct(
            (batch_size, num_channels, num_tokens), embeddings.dtype
        ),
        grid_spec=pltpu.PrefetchScalarGridSpec(
            num_scalar_prefetch=0,
            grid=grid,
            in_specs=[
                pl.BlockSpec((tb, tl, num_channels), lambda b, l: (b, l, 0)),
            ],
            out_specs=pl.BlockSpec((tb, num_channels, tl), lambda b, l: (b, 0, l)),
        ),
        compiler_params=pltpu.CompilerParams(
            # Every output block is written exactly once -> both axes parallel
            # (megacore-shardable on v7x).
            dimension_semantics=("parallel", "parallel"),
            vmem_limit_bytes=vmem_limit,
        ),
    )(embeddings)

    # (B, C, L) -> (B, C, H, W): contiguous split of the last dim, metadata-only.
    return out.reshape(batch_size, num_channels, height, width)


def patch_unembed_ref(embeddings, x_size):
    """Pure-JAX reference mirroring the PyTorch forward."""
    batch_size, _, num_channels = embeddings.shape
    height, width = x_size
    return jnp.transpose(embeddings, (0, 2, 1)).reshape(
        batch_size, num_channels, height, width
    )


if __name__ == "__main__":
    key = jax.random.PRNGKey(0)

    # Main config: batch=2, embed_dim=128, x_size=(16, 16) -> seq len 256.
    B, C, H, W = 2, 128, 16, 16
    embeddings = jax.random.normal(key, (B, H * W, C), dtype=jnp.float32)
    out = jax.block_until_ready(patch_unembed_pallas(embeddings, (H, W)))
    ref = patch_unembed_ref(embeddings, (H, W))
    assert out.shape == (B, C, H, W), out.shape
    assert jnp.array_equal(out, ref), "mismatch vs reference (f32)"

    # Ragged config: seq len 225 (not a multiple of 128), C=180 (not mult of 8), bf16.
    B2, C2, H2, W2 = 2, 180, 15, 15
    emb2 = jax.random.normal(
        jax.random.PRNGKey(0), (B2, H2 * W2, C2), dtype=jnp.bfloat16
    )
    out2 = jax.block_until_ready(patch_unembed_pallas(emb2, (H2, W2)))
    ref2 = patch_unembed_ref(emb2, (H2, W2))
    assert out2.shape == (B2, C2, H2, W2), out2.shape
    assert jnp.array_equal(out2, ref2), "mismatch vs reference (bf16 ragged)"

    print("KERNEL_OK")
</pallas_src>

<mosaic_0001>
module attributes {stable_mosaic.version = 11 : i64} {
  func.func @_unembed_kernel(%arg0: i32, %arg1: i32, %arg2: memref<1x256x128xf32, #tpu.memory_space<vmem>>, %arg3: memref<1x128x256xf32, #tpu.memory_space<vmem>>) attributes {dimension_semantics = [#tpu.dimension_semantics<parallel>, #tpu.dimension_semantics<parallel>], iteration_bounds = array<i64: 2, 1>, scalar_prefetch = 0 : i64, scratch_operands = 0 : i64, tpu.core_type = #tpu.core_type<tc>, window_params = [{transform_indices = @transform_0, window_bounds = array<i64: 1, 256, 128>}, {transform_indices = @transform_1, window_bounds = array<i64: 1, 128, 256>}]} {
    %c0 = arith.constant 0 : index
    %c0_0 = arith.constant 0 : index
    %c0_1 = arith.constant 0 : index
    %0 = vector.load %arg2[%c0, %c0_0, %c0_1] : memref<1x256x128xf32, #tpu.memory_space<vmem>>, vector<1x256x128xf32>
    %1 = tpu.transpose %0, [0, 2, 1] : vector<1x256x128xf32> -> vector<1x128x256xf32>
    %c0_2 = arith.constant 0 : index
    %c0_3 = arith.constant 0 : index
    %c0_4 = arith.constant 0 : index
    %2 = vector.load %arg3[%c0_2, %c0_3, %c0_4] : memref<1x128x256xf32, #tpu.memory_space<vmem>>, vector<1x128x256xf32>
    tpu.vector_store %arg3[%c0_2, %c0_3, %c0_4], %1 {strides = array<i32>} : memref<1x128x256xf32, #tpu.memory_space<vmem>>, vector<1x128x256xf32>,
    return
  }
  func.func @transform_0(%arg0: i32, %arg1: i32) -> (i32, i32, i32) {
    %c0_i32 = arith.constant 0 : i32
    %c0_i32_0 = arith.constant 0 : i32
    return %arg0, %arg1, %c0_i32 : i32, i32, i32
  }
  func.func @transform_1(%arg0: i32, %arg1: i32) -> (i32, i32, i32) {
    %c0_i32 = arith.constant 0 : i32
    %c0_i32_0 = arith.constant 0 : i32
    return %arg0, %c0_i32, %arg1 : i32, i32, i32
  }
}

</mosaic_0001>

<bundles_post_ra>
// kernel: tpu_custom_call.1
= control target key start
LH: loop header
LB: loop body
LE: loop exit
PB: predicated region body
PF: predicated region fallthrough
CT: control target
= control target key end

     0   :  { %6 = vsyncpa [#allocation3], 0  ;;  %s847_s0 = inlined_call_operand.hbm [shape: f32[2,256,128], index: 0, kind: input, shape index: {}]   ;;  %s848_s1 = inlined_call_operand.hbm [shape: f32[2,128,256], index: 1, kind: output, shape index: {}]  }
   0x1   :  { %8 = vsyncpa [#allocation3 + $0x1], 0 }
   0x2   :  { %9 = vsyncpa [#allocation4], 0 }
   0x3   :  { %11 = vsyncpa [#allocation4 + $0x1], 0  ;;  %s599_s6 = smov 0   ;;  %s601_s7 = smov 0  }
   0x4   :  { %s603_s8 = smov 0   ;;  %s605_s9 = smov 0  }
   0x5   :  { %s607_s10 = smov 0   ;;  %s609_s11 = smov 0  }
   0x6 LB: > { %s386_s12 = sadd.s32 4294967295, %s581_s11   ;;  %s387_s13 = sadd.s32 4294967294, %s581_s11   ;;  %s581_s11 = sphi %s609_s11, %s17_s11   ;;  %s577_s10 = sphi %s607_s10, %s863_s10   ;;  %s573_s9 = sphi %s605_s9, %s862_s9   ;;  %s569_s8 = sphi %s603_s8, %s861_s8   ;;  %s565_s7 = sphi %s601_s7, %s860_s7   ;;  %s561_s6 = sphi %s599_s6, %s859_s6  }
   0x7   : > { %s29_s14 = sadd.s32 1, %s577_s10  ;;  %s38_s15 = sadd.s32 1, %s569_s8 }
   0x8   : > { %p31_p0 = scmp.ge.s32.totalorder %s29_s14, 2  ;;  %p45_p1 = scmp.ne.s32.totalorder %s569_s8, %s565_s7 }
   0x9   : > { %p46_p2 = scmp.eq.s32.totalorder %s581_s11, 0  ;;  %p51_p3 = scmp.ne.s32.totalorder %s565_s7, %s561_s6 }
   0xa   : > { %s865_s14 = smov (%p31_p0, %s29_s14), 0  ;;  %p52_p5 = scmp.eq.s32.totalorder %s386_s12, 0 }
   0xb   : > { %p640_p4 = por %p46_p2, %p45_p1  ;;  %s33_s17 = ssub.s32 %s577_s10, %s865_s14 }
   0xc   : > { %p77_p6 = scmp.eq.s32.totalorder %s386_s12, 1  ;;  %p36_p7 = scmp.eq.s32.totalorder %s33_s17, 0 }
   0xd   : > { %p646_p8 = por %p52_p5, %p51_p3  ;;  %p83_p10 = scmp.eq.s32.totalorder %s387_s13, 1 }
   0xe   : > { %p650_p9 = por %p77_p6, %p45_p1  ;;  %p415_p13 = scmp.lt.s32.totalorder %s581_s11, 2 }
   0xf   : > { %s655_s20 = scalar_select %p36_p7, %s569_s8, %s38_s15  }
  0x10   : > { %s852_s19 = scalar_select %p650_p9, 1, 0 }
  0x11   : > { %p657_p11 = por %p83_p10, %p51_p3  ;;  %s103_s22 = sand.u32 1, %s569_s8  }
  0x12   : > { %s390_s23 = sshll.u32 %s103_s22, 8  ;;  %s401_s24 = sshll.u32 %s577_s10, 12 }
  0x13   : > { %s853_s21 = scalar_select %p657_p11, 1, 0 }
  0x14   : > { %s668_s27 = scalar_lea.hbm %s847_s0, %s401_s24  ;;  %s107_s28 = scalar_lea.vmem [#allocation2], %s390_s23 }
  0x15   : > { %s116_s29 = sshll.u32 %s107_s28, 4  ;;  %p674_p0 = pnand %p415_p13, %p640_p4  ;;  %s670_s29 = int_to_ptr.vmem [resolvable:$true] %s116_s29 }
  0x16   : > { %s679_s2 = scalar_lea.sflag [#allocation3], %s103_s22  ;;  %s469_s3 = scalar_lea.hbm %s668_s27, 4096 }
  0x17   : > { %p470_p2 = scmp.ne.s32.totalorder %s668_s27, %s469_s3  ;;  %p471_p3 = pneg %p674_p0 }
  0x18   : > { %s474_s12 = scalar_lea.hbm %s847_s0, 8192  ;;  %p475_p4 = scmp.lt.u32.totalorder %s668_s27, %s847_s0 }
  0x19   : > { %p472_p5 = pnand %p471_p3, %p470_p2  ;;  %p476_p7 = scmp.lt.u32.totalorder %s474_s12, %s469_s3 }
  0x1a   : > { %p478_p13 = scmp.lt.u32.totalorder %s469_s3, %s668_s27 }
  0x1b   : > { %p473_p6 = pneg %p472_p5  ;;  %p477_p10 = por %p476_p7, %p475_p4 }
  0x1d   : > { %p479_p12 = por %p478_p13, %p477_p10 }
  0x1f   : > { %p480_p1 = pnand %p479_p12, %p473_p6 }
  0x21   : > { %483 = shalt.err (!%p480_p1)
}
  0x22   : > { %s484_s16 = scalar_lea.vmem %s670_s29, 4096  ;;  %s583_s17 = smov [#allocation2]  }
  0x23   : > { %p485_p2 = scmp.ne.s32.totalorder %s670_s29, %s484_s16  ;;  %s489_s22 = sshll.u32 %s583_s17, 4  ;;  %s490_s22 = int_to_ptr.vmem [resolvable:$false] %s489_s22 }
  0x24   : > { %s491_s23 = scalar_lea.vmem %s490_s22, 8192  ;;  %p492_p9 = scmp.lt.s32.totalorder %s670_s29, %s490_s22 }
  0x25   : > { %p487_p5 = pnand %p485_p2, %p471_p3  ;;  %p493_p4 = scmp.lt.s32.totalorder %s491_s23, %s484_s16 }
  0x27   : > { %p488_p11 = pneg %p487_p5  ;;  %p494_p7 = por %p493_p4, %p492_p9 }
  0x29   : > { %p495_p10 = pnand %p494_p7, %p488_p11 }
  0x2b   : > { %498 = shalt.err (!%p495_p10)
}
  0x2c   : > { %s584_s24 = smov 128   ;;  %s585_s25 = smov 8  }
  0x2d   : > { %410 = dma.hbm_to_vmem [thread:$0]  (!%p674_p0), %s668_s27, 4096, %s670_s29, %s679_s2, %s584_s24, %s584_s24, %s585_s25  }
  0x2e   : > { %p124_p12 = scmp.lt.s32.totalorder %s581_s11, 3  ;;  %p855_p1 = scmp.ge.s32.totalorder %s581_s11, 1 }
  0x30   : > { %p125_p3 = pnand %p855_p1, %p124_p12 }
  0x31   : > { %s711_s26 = sand.u32 (!%p125_p3), 1, %s565_s7  }
  0x32   : > { %128 = sbr.rel (%p125_p3) target bundleno = 264 (0x108), region = 24  ;;  %s394_s28 = sshll.u32 (!%p125_p3), %s711_s26, 8 }
  0x33   : > { %s131_s3 = scalar_lea.sflag (!%p125_p3), [#allocation3], %s711_s26  ;;  %s717_s4 = scalar_lea.vmem (!%p125_p3), [#allocation2], %s394_s28 }
  0x39   : > { %552 = dma.done.wait (%p646_p8), %s131_s3, 4096  }
  0x3a   : > { %554 = vsyncadd (%p646_p8), %s131_s3, 4294963200  ;;  %v171_v0 = vld [vmem:[%s717_s4 + $0x80] sm:$0xff]  ;;  %v172_v2 = vld [vmem:[%s717_s4 + $0x88] sm:$0xff]  ;;  %s757_s18 = scalar_lea.vmem [#allocation5], %s394_s28  ;;  %s402_s27 = sshll.u32 %s573_s9, 12 }
  0x3b   : > { %v155_v1 = vld [vmem:[%s717_s4] sm:$0xff]  ;;  %219 = vxpose.xlu1.b32.start [1/16] %v171_v0, 128  ;;  %v156_v3 = vld [vmem:[%s717_s4 + $0x8] sm:$0xff]  ;;  %v173_v4 = vld [vmem:[%s717_s4 + $0x90] sm:$0xff]  ;;  %s299_s29 = sshll.u32 %s757_s18, 4  ;;  %s794_s5 = scalar_lea.hbm %s848_s1, %s402_s27  ;;  %s796_s29 = int_to_ptr.vmem [resolvable:$true] %s299_s29 }
  0x3c   : > { %187 = vxpose.xlu0.b32.start [1/16] %v155_v1, 128  ;;  %v157_v5 = vld [vmem:[%s717_s4 + $0x10] sm:$0xff]  ;;  %v174_v6 = vld [vmem:[%s717_s4 + $0x98] sm:$0xff]  ;;  %v175_v8 = vld [vmem:[%s717_s4 + $0xa0] sm:$0xff]  ;;  %s284_s9 = scalar_lea.sflag [#allocation4], %s711_s26  ;;  %s499_s12 = scalar_lea.vmem %s796_s29, 4096 }
  0x3d   : > { %v158_v7 = vld [vmem:[%s717_s4 + $0x18] sm:$0xff]  ;;  %v159_v9 = vld [vmem:[%s717_s4 + $0x20] sm:$0xff]  ;;  %v176_v10 = vld [vmem:[%s717_s4 + $0xa8] sm:$0xff]  ;;  %p500_p8 = scmp.ne.s32.totalorder %s796_s29, %s499_s12  ;;  %p856_p9 = scmp.ne.s32.totalorder %s852_s19, 0 }
  0x3e   : > { %v160_v11 = vld [vmem:[%s717_s4 + $0x28] sm:$0xff]  ;;  %v177_v12 = vld [vmem:[%s717_s4 + $0xb0] sm:$0xff]  ;;  %v178_v14 = vld [vmem:[%s717_s4 + $0xb8] sm:$0xff]  ;;  %s586_s13 = smov [#allocation5]  }
  0x3f   : > { %220 = vxpose.xlu1.b32.cont [2/16] %v172_v2, 128  ;;  %v161_v13 = vld [vmem:[%s717_s4 + $0x30] sm:$0xff]  ;;  %v162_v15 = vld [vmem:[%s717_s4 + $0x38] sm:$0xff]  ;;  %v179_v16 = vld [vmem:[%s717_s4 + $0xc0] sm:$0xff]  ;;  %p501_p11 = pnand %p500_p8, %p856_p9  ;;  %s503_s15 = sshll.u32 %s586_s13, 4  ;;  %s504_s15 = int_to_ptr.vmem [resolvable:$false] %s503_s15 }
  0x40   : > { %188 = vxpose.xlu0.b32.cont [2/16] %v156_v3, 128  ;;  %v163_v17 = vld [vmem:[%s717_s4 + $0x40] sm:$0xff]  ;;  %v180_v18 = vld [vmem:[%s717_s4 + $0xc8] sm:$0xff]  ;;  %v181_v20 = vld [vmem:[%s717_s4 + $0xd0] sm:$0xff]  ;;  %s505_s16 = scalar_lea.vmem %s504_s15, 8192  ;;  %p506_p6 = scmp.lt.s32.totalorder %s796_s29, %s504_s15 }
  0x41   : > { %v164_v19 = vld [vmem:[%s717_s4 + $0x48] sm:$0xff]  ;;  %v165_v21 = vld [vmem:[%s717_s4 + $0x50] sm:$0xff]  ;;  %v182_v22 = vld [vmem:[%s717_s4 + $0xd8] sm:$0xff]  ;;  %p502_p0 = pneg %p501_p11  ;;  %p507_p13 = scmp.lt.s32.totalorder %s505_s16, %s499_s12 }
  0x42   : > { %v166_v23 = vld [vmem:[%s717_s4 + $0x58] sm:$0xff]  ;;  %v183_v24 = vld [vmem:[%s717_s4 + $0xe0] sm:$0xff]  ;;  %v184_v26 = vld [vmem:[%s717_s4 + $0xe8] sm:$0xff] }
  0x43   : > { %221 = vxpose.xlu1.b32.cont [3/16] %v173_v4, 128  ;;  %v167_v25 = vld [vmem:[%s717_s4 + $0x60] sm:$0xff]  ;;  %v168_v27 = vld [vmem:[%s717_s4 + $0x68] sm:$0xff]  ;;  %v185_v28 = vld [vmem:[%s717_s4 + $0xf0] sm:$0xff]  ;;  %p508_p2 = por %p507_p13, %p506_p6 }
  0x44   : > { %189 = vxpose.xlu0.b32.cont [3/16] %v157_v5, 128  ;;  %v169_v29 = vld [vmem:[%s717_s4 + $0x70] sm:$0xff]  ;;  %v186_v30 = vld [vmem:[%s717_s4 + $0xf8] sm:$0xff] }
  0x45   : > { %v170_v31 = vld [vmem:[%s717_s4 + $0x78] sm:$0xff]  ;;  %p509_p5 = pnand %p508_p2, %p502_p0 }
  0x47   : > { %222 = vxpose.xlu1.b32.cont [4/16] %v174_v6, 128 }
  0x48   : > { %190 = vxpose.xlu0.b32.cont [4/16] %v158_v7, 128 }
  0x4b   : > { %223 = vxpose.xlu1.b32.cont [5/16] %v175_v8, 128 }
  0x4c   : > { %191 = vxpose.xlu0.b32.cont [5/16] %v159_v9, 128 }
  0x4f   : > { %224 = vxpose.xlu1.b32.cont [6/16] %v176_v10, 128 }
  0x50   : > { %192 = vxpose.xlu0.b32.cont [6/16] %v160_v11, 128 }
  0x53   : > { %225 = vxpose.xlu1.b32.cont [7/16] %v177_v12, 128 }
  0x54   : > { %193 = vxpose.xlu0.b32.cont [7/16] %v161_v13, 128 }
  0x57   : > { %226 = vxpose.xlu1.b32.cont [8/16] %v178_v14, 128 }
  0x58   : > { %194 = vxpose.xlu0.b32.cont [8/16] %v162_v15, 128 }
  0x5b   : > { %227 = vxpose.xlu1.b32.cont [9/16] %v179_v16, 128 }
  0x5c   : > { %195 = vxpose.xlu0.b32.cont [9/16] %v163_v17, 128 }
  0x5f   : > { %228 = vxpose.xlu1.b32.cont [10/16] %v180_v18, 128 }
  0x60   : > { %196 = vxpose.xlu0.b32.cont [10/16] %v164_v19, 128 }
  0x63   : > { %229 = vxpose.xlu1.b32.cont [11/16] %v181_v20, 128 }
  0x64   : > { %197 = vxpose.xlu0.b32.cont [11/16] %v165_v21, 128 }
  0x67   : > { %230 = vxpose.xlu1.b32.cont [12/16] %v182_v22, 128 }
  0x68   : > { %198 = vxpose.xlu0.b32.cont [12/16] %v166_v23, 128 }
  0x6b   : > { %231 = vxpose.xlu1.b32.cont [13/16] %v183_v24, 128 }
  0x6c   : > { %199 = vxpose.xlu0.b32.cont [13/16] %v167_v25, 128 }
  0x6f   : > { %232 = vxpose.xlu1.b32.cont [14/16] %v184_v26, 128 }
  0x70   : > { %200 = vxpose.xlu0.b32.cont [14/16] %v168_v27, 128 }
  0x73   : > { %233 = vxpose.xlu1.b32.cont [15/16] %v185_v28, 128 }
  0x74   : > { %201 = vxpose.xlu0.b32.cont [15/16] %v169_v29, 128 }
  0x77   : > { %234 = vxpose.xlu1.b32.end [16/16] %v186_v30, 128 }
  0x78   : > { %202 = vxpose.xlu0.b32.end [16/16] %v170_v31, 128 }
  0xbb   : > { %v235_v32 = vpop.trf.xlu1 }
  0xbc   : > { %v203_v33 = vpop.trf.xlu0  ;;  %252 = vst [vmem:[%s757_s18 + $0x8] sm:$0xff] %v235_v32 }
  0xbd   : > { %251 = vst [vmem:[%s757_s18] sm:$0xff] %v203_v33 }
  0xbf   : > { %v236_v34 = vpop.trf.xlu1 }
  0xc0   : > { %v204_v35 = vpop.trf.xlu0  ;;  %254 = vst [vmem:[%s757_s18 + $0x18] sm:$0xff] %v236_v34 }
  0xc1   : > { %253 = vst [vmem:[%s757_s18 + $0x10] sm:$0xff] %v204_v35 }
  0xc3   : > { %v237_v36 = vpop.trf.xlu1 }
  0xc4   : > { %v205_v37 = vpop.trf.xlu0  ;;  %256 = vst [vmem:[%s757_s18 + $0x28] sm:$0xff] %v237_v36 }
  0xc5   : > { %255 = vst [vmem:[%s757_s18 + $0x20] sm:$0xff] %v205_v37 }
  0xc7   : > { %v238_v38 = vpop.trf.xlu1 }
  0xc8   : > { %v206_v39 = vpop.trf.xlu0  ;;  %258 = vst [vmem:[%s757_s18 + $0x38] sm:$0xff] %v238_v38 }
  0xc9   : > { %257 = vst [vmem:[%s757_s18 + $0x30] sm:$0xff] %v206_v39 }
  0xcb   : > { %v239_v40 = vpop.trf.xlu1 }
  0xcc   : > { %v207_v41 = vpop.trf.xlu0  ;;  %260 = vst [vmem:[%s757_s18 + $0x48] sm:$0xff] %v239_v40 }
  0xcd   : > { %259 = vst [vmem:[%s757_s18 + $0x40] sm:$0xff] %v207_v41 }
  0xcf   : > { %v240_v42 = vpop.trf.xlu1 }
  0xd0   : > { %v208_v43 = vpop.trf.xlu0  ;;  %262 = vst [vmem:[%s757_s18 + $0x58] sm:$0xff] %v240_v42 }
  0xd1   : > { %261 = vst [vmem:[%s757_s18 + $0x50] sm:$0xff] %v208_v43 }
  0xd3   : > { %v241_v44 = vpop.trf.xlu1 }
  0xd4   : > { %v209_v45 = vpop.trf.xlu0  ;;  %264 = vst [vmem:[%s757_s18 + $0x68] sm:$0xff] %v241_v44 }
  0xd5   : > { %263 = vst [vmem:[%s757_s18 + $0x60] sm:$0xff] %v209_v45 }
  0xd7   : > { %v242_v46 = vpop.trf.xlu1 }
  0xd8   : > { %v210_v47 = vpop.trf.xlu0  ;;  %266 = vst [vmem:[%s757_s18 + $0x78] sm:$0xff] %v242_v46 }
  0xd9   : > { %265 = vst [vmem:[%s757_s18 + $0x70] sm:$0xff] %v210_v47 }
  0xdb   : > { %v243_v48 = vpop.trf.xlu1 }
  0xdc   : > { %v211_v49 = vpop.trf.xlu0  ;;  %268 = vst [vmem:[%s757_s18 + $0x88] sm:$0xff] %v243_v48 }
  0xdd   : > { %267 = vst [vmem:[%s757_s18 + $0x80] sm:$0xff] %v211_v49 }
  0xdf   : > { %v244_v50 = vpop.trf.xlu1 }
  0xe0   : > { %v212_v51 = vpop.trf.xlu0  ;;  %270 = vst [vmem:[%s757_s18 + $0x98] sm:$0xff] %v244_v50 }
  0xe1   : > { %269 = vst [vmem:[%s757_s18 + $0x90] sm:$0xff] %v212_v51 }
  0xe3   : > { %v245_v52 = vpop.trf.xlu1 }
  0xe4   : > { %v213_v53 = vpop.trf.xlu0  ;;  %272 = vst [vmem:[%s757_s18 + $0xa8] sm:$0xff] %v245_v52 }
  0xe5   : > { %271 = vst [vmem:[%s757_s18 + $0xa0] sm:$0xff] %v213_v53 }
  0xe7   : > { %v246_v54 = vpop.trf.xlu1 }
  0xe8   : > { %v214_v55 = vpop.trf.xlu0  ;;  %274 = vst [vmem:[%s757_s18 + $0xb8] sm:$0xff] %v246_v54 }
  0xe9   : > { %273 = vst [vmem:[%s757_s18 + $0xb0] sm:$0xff] %v214_v55 }
  0xeb   : > { %v247_v56 = vpop.trf.xlu1 }
  0xec   : > { %v215_v57 = vpop.trf.xlu0  ;;  %276 = vst [vmem:[%s757_s18 + $0xc8] sm:$0xff] %v247_v56 }
  0xed   : > { %275 = vst [vmem:[%s757_s18 + $0xc0] sm:$0xff] %v215_v57 }
  0xef   : > { %v248_v58 = vpop.trf.xlu1 }
  0xf0   : > { %v216_v59 = vpop.trf.xlu0  ;;  %278 = vst [vmem:[%s757_s18 + $0xd8] sm:$0xff] %v248_v58 }
  0xf1   : > { %277 = vst [vmem:[%s757_s18 + $0xd0] sm:$0xff] %v216_v59 }
  0xf3   : > { %v249_v60 = vpop.trf.xlu1 }
  0xf4   : > { %v217_v61 = vpop.trf.xlu0  ;;  %280 = vst [vmem:[%s757_s18 + $0xe8] sm:$0xff] %v249_v60 }
  0xf5   : > { %279 = vst [vmem:[%s757_s18 + $0xe0] sm:$0xff] %v217_v61 }
  0xf7   : > { %v250_v62 = vpop.trf.xlu1 }
  0xf8   : > { %v218_v63 = vpop.trf.xlu0  ;;  %282 = vst [vmem:[%s757_s18 + $0xf8] sm:$0xff] %v250_v62 }
  0xf9   : > { %281 = vst [vmem:[%s757_s18 + $0xf0] sm:$0xff] %v218_v63 }
  0xfa   : > { %512 = shalt.err (!%p509_p5)
}
  0xfb   : > { %s513_s17 = scalar_lea.hbm %s794_s5, 4096  ;;  %s517_s24 = scalar_lea.hbm %s848_s1, 8192 }
  0xfc   : > { %p514_p4 = scmp.ne.s32.totalorder %s794_s5, %s513_s17  ;;  %p518_p12 = scmp.lt.u32.totalorder %s794_s5, %s848_s1 }
  0xfd   : > { %p519_p1 = scmp.lt.u32.totalorder %s517_s24, %s513_s17  ;;  %p521_p8 = scmp.lt.u32.totalorder %s513_s17, %s794_s5 }
  0xfe   : > { %p515_p7 = pnand %p514_p4, %p856_p9 }
  0xff   : > { %p520_p3 = por %p519_p1, %p518_p12 }
 0x100   : > { %p516_p10 = pneg %p515_p7 }
 0x101   : > { %p522_p11 = por %p521_p8, %p520_p3 }
 0x103   : > { %p523_p0 = pnand %p522_p11, %p516_p10 }
 0x105   : > { %526 = shalt.err (!%p523_p0)
}
 0x106   : > { %s587_s3 = smov 256   ;;  %s588_s4 = smov 16  }
 0x107   : > { %405 = dma.vmem_to_hbm [thread:$0]  (%p856_p9), %s796_s29, 4096, %s794_s5, %s284_s9, %s587_s3, %s587_s3, %s588_s4  }
 0x108 PF: > { %s314_s18 = sand.u32 1, %s561_s6   ;;  %p857_p6 = scmp.ne.s32.totalorder %s853_s21, 0 }
 0x109   : > { %p858_p13 = scmp.ge.s32.totalorder %s581_s11, 2  ;;  %s315_s27 = scalar_lea.sflag [#allocation4], %s314_s18 }
 0x10b   : > { %p412_p2 = pnand %p858_p13, %p857_p6 }
 0x10d   : > { %556 = dma.done.wait (!%p412_p2), %s315_s27, 4096  }
 0x10e   : > { %558 = vsyncadd (!%p412_p2), %s315_s27, 4294963200  ;;  %s17_s11 = sadd.s32 1, %s581_s11   ;;  %s859_s6 = smov %s565_s7 }
 0x10f   : > { %p14_p5 = scmp.ge.s32.totalorder %s17_s11, 4   ;;  %s860_s7 = smov %s569_s8 }
 0x110   : > { %s861_s8 = smov %s655_s20  ;;  %s862_s9 = smov %s577_s10 }
 0x111   : > { %s863_s10 = smov %s865_s14  ;;  %16 = sbr.rel (!%p14_p5) target bundleno = 6 (0x6), region = 69 }
 0x118   :  { %320 = vsyncpa [#allocation3], 1 }
 0x119   :  { %322 = vsyncpa [#allocation3 + $0x1], 1 }
 0x11a   :  { %323 = vsyncpa [#allocation4], 1 }
 0x11b   :  { %325 = vsyncpa [#allocation4 + $0x1], 1 }

</bundles_post_ra>
